<compile_context>
chip_gen: v7x
topology: tpu7x:2x2x1
jax: 0.10.0
libtpu: 0.0.40
codegen_flags: <defaults>
</compile_context>

<pallas_src>
import functools

import jax
import jax.numpy as jnp
from jax import lax
from jax.experimental import pallas as pl
from jax.experimental.pallas import tpu as pltpu


def _lstm_kernel(x_ref, w_ih_ref, w_hh_ref, b_ref, w_out_ref, b_out_ref,
                 out_ref, xg_scr, hs_scr, *, seq_len, batch, hidden):
    """Single-invocation LSTM forward.

    x_ref:     (S*B, I)   flattened time-major inputs
    w_ih_ref:  (I, 4H)    input->gates weights (transposed torch weight_ih)
    w_hh_ref:  (H, 4H)    hidden->gates weights (transposed torch weight_hh)
    b_ref:     (1, 4H)    bias_ih + bias_hh
    w_out_ref: (H, 1)     final Linear weight (transposed)
    b_out_ref: (1, 1)     final Linear bias (SMEM scalar)
    out_ref:   (S*B, 1)   predictions
    xg_scr:    (S*B, 4H)  VMEM scratch: precomputed input-gate pre-activations
    hs_scr:    (S*B, H)   VMEM scratch: all hidden states (lane-dense)
    """
    # ---- Phase 1 (parallel): all-steps input projection, one MXU matmul ----
    xg_scr[...] = (
        jnp.dot(x_ref[...], w_ih_ref[...], preferred_element_type=jnp.float32)
        + b_ref[...])

    w_hh = w_hh_ref[...]                                  # loaded once, stays resident

    # ---- Phase 2 (serial): recurrence, fully unrolled; h/c stay in vregs ----
    h = jnp.zeros((batch, hidden), jnp.float32)
    c = jnp.zeros((batch, hidden), jnp.float32)
    for t in range(seq_len):                              # static unroll (S is small)
        xg_t = xg_scr[pl.ds(t * batch, batch), :]         # (B, 4H), static offset
        gates = xg_t + jnp.dot(h, w_hh, preferred_element_type=jnp.float32)
        # torch gate order [i, f, g, o]
        i_g = jax.nn.sigmoid(gates[:, 0 * hidden:1 * hidden])
        f_g = jax.nn.sigmoid(gates[:, 1 * hidden:2 * hidden])
        g_g = jnp.tanh(gates[:, 2 * hidden:3 * hidden])
        o_g = jax.nn.sigmoid(gates[:, 3 * hidden:4 * hidden])
        c = f_g * c + i_g * g_g
        h = o_g * jnp.tanh(c)
        hs_scr[pl.ds(t * batch, batch), :] = h            # lane-dense (B, H) store

    # ---- Phase 3 (parallel): batched output projection, single matmul ------
    pred = (jnp.dot(hs_scr[...], w_out_ref[...],
                    preferred_element_type=jnp.float32)
            + b_out_ref[0, 0])                            # (S*B, 1)
    out_ref[...] = pred.astype(out_ref.dtype)


def lstm_forward(x, params):
    """x: (S, B, *feature_dims) float32. Returns (S, B, 1)."""
    S, B = x.shape[0], x.shape[1]
    x = x.reshape(S, B, -1)                               # torch .view(-1, B, prod(feat))
    I = x.shape[2]
    H = params["w_hh_t"].shape[0]

    x2 = x.reshape(S * B, I)                              # row s*B + b  <->  (s, b)

    kernel = functools.partial(_lstm_kernel, seq_len=S, batch=B, hidden=H)

    out = pl.pallas_call(
        kernel,
        out_shape=jax.ShapeDtypeStruct((S * B, 1), jnp.float32),
        in_specs=[
            pl.BlockSpec(memory_space=pltpu.MemorySpace.VMEM),   # x2
            pl.BlockSpec(memory_space=pltpu.MemorySpace.VMEM),   # w_ih_t
            pl.BlockSpec(memory_space=pltpu.MemorySpace.VMEM),   # w_hh_t
            pl.BlockSpec(memory_space=pltpu.MemorySpace.VMEM),   # b_all
            pl.BlockSpec(memory_space=pltpu.MemorySpace.VMEM),   # w_out_t
            pl.BlockSpec(memory_space=pltpu.MemorySpace.SMEM),   # b_out scalar
        ],
        out_specs=pl.BlockSpec(memory_space=pltpu.MemorySpace.VMEM),
        scratch_shapes=[
            pltpu.VMEM((S * B, 4 * H), jnp.float32),             # xg
            pltpu.VMEM((S * B, H), jnp.float32),                 # hidden states
        ],
    )(x2, params["w_ih_t"], params["w_hh_t"], params["b_all"],
      params["w_out_t"], params["b_out"])

    return out.reshape(S, B, 1)


def init_params(key, input_size, hidden_size):
    """Deterministic init mimicking torch's uniform(-1/sqrt(H), 1/sqrt(H))."""
    k = 1.0 / jnp.sqrt(hidden_size)
    keys = jax.random.split(key, 6)
    w_ih = jax.random.uniform(keys[0], (4 * hidden_size, input_size),
                              jnp.float32, -k, k)
    w_hh = jax.random.uniform(keys[1], (4 * hidden_size, hidden_size),
                              jnp.float32, -k, k)
    b_ih = jax.random.uniform(keys[2], (4 * hidden_size,), jnp.float32, -k, k)
    b_hh = jax.random.uniform(keys[3], (4 * hidden_size,), jnp.float32, -k, k)
    k_lin = 1.0 / jnp.sqrt(hidden_size)
    w_out = jax.random.uniform(keys[4], (1, hidden_size), jnp.float32,
                               -k_lin, k_lin)
    b_out = jax.random.uniform(keys[5], (1,), jnp.float32, -k_lin, k_lin)
    return {
        "w_ih_t": w_ih.T,                              # (I, 4H)
        "w_hh_t": w_hh.T,                              # (H, 4H)
        "b_all": (b_ih + b_hh).reshape(1, -1),         # (1, 4H)
        "w_out_t": w_out.T,                            # (H, 1)
        "b_out": b_out.reshape(1, 1),                  # (1, 1)
    }


def lstm_reference(x, params):
    """Pure-JAX reference (lax.scan) of the same forward, for verification."""
    S, B = x.shape[0], x.shape[1]
    x = x.reshape(S, B, -1)
    H = params["w_hh_t"].shape[0]

    def step(carry, xg_t):
        h, c = carry
        gates = xg_t + h @ params["w_hh_t"]
        i_g = jax.nn.sigmoid(gates[:, 0 * H:1 * H])
        f_g = jax.nn.sigmoid(gates[:, 1 * H:2 * H])
        g_g = jnp.tanh(gates[:, 2 * H:3 * H])
        o_g = jax.nn.sigmoid(gates[:, 3 * H:4 * H])
        c_new = f_g * c + i_g * g_g
        h_new = o_g * jnp.tanh(c_new)
        return (h_new, c_new), h_new

    xg = x @ params["w_ih_t"] + params["b_all"]          # same association as kernel
    h0 = jnp.zeros((B, H), jnp.float32)
    c0 = jnp.zeros((B, H), jnp.float32)
    _, hs = lax.scan(step, (h0, c0), xg)
    return hs @ params["w_out_t"] + params["b_out"]


if __name__ == "__main__":
    SEQ, BATCH, F1, F2 = 8, 2, 4, 4      # input_size = F1*F2 = 16
    HIDDEN = 32

    key = jax.random.PRNGKey(0)
    key_x, key_p = jax.random.split(key)
    x = jax.random.normal(key_x, (SEQ, BATCH, F1, F2), jnp.float32)
    params = init_params(key_p, input_size=F1 * F2, hidden_size=HIDDEN)

    out = lstm_forward(x, params)
    out = jax.block_until_ready(out)

    ref = lstm_reference(x, params)
    assert out.shape == (SEQ, BATCH, 1), out.shape
    assert jnp.allclose(out, ref, atol=1e-5, rtol=1e-5), \
        float(jnp.max(jnp.abs(out - ref)))

    print("KERNEL_OK")
</pallas_src>

<mosaic_0001>
module attributes {stable_mosaic.version = 11 : i64} {
  func.func @_lstm_kernel(%arg0: memref<16x16xf32, #tpu.memory_space<vmem>>, %arg1: memref<16x128xf32, #tpu.memory_space<vmem>>, %arg2: memref<32x128xf32, #tpu.memory_space<vmem>>, %arg3: memref<1x128xf32, #tpu.memory_space<vmem>>, %arg4: memref<32x1xf32, #tpu.memory_space<vmem>>, %arg5: memref<1x1xf32, #tpu.memory_space<smem>>, %arg6: memref<16x1xf32, #tpu.memory_space<vmem>>, %arg7: memref<16x128xf32, #tpu.memory_space<vmem>>, %arg8: memref<16x32xf32, #tpu.memory_space<vmem>>) attributes {dimension_semantics = [], scalar_prefetch = 0 : i64, scratch_operands = 2 : i64, tpu.core_type = #tpu.core_type<tc>} {
    %c0 = arith.constant 0 : index
    %c0_0 = arith.constant 0 : index
    %0 = vector.load %arg0[%c0, %c0_0] : memref<16x16xf32, #tpu.memory_space<vmem>>, vector<16x16xf32>
    %c0_1 = arith.constant 0 : index
    %c0_2 = arith.constant 0 : index
    %1 = vector.load %arg1[%c0_1, %c0_2] : memref<16x128xf32, #tpu.memory_space<vmem>>, vector<16x128xf32>
    %cst = arith.constant dense<0.000000e+00> : vector<16x128xf32>
    %2 = tpu.matmul %0, %1, %cst {dimension_numbers = #tpu.dot_dimension_numbers<[1], [0], [0], [1], [0, 0, 1, 1], [], []>} : vector<16x16xf32>, vector<16x128xf32>, vector<16x128xf32> -> vector<16x128xf32>
    %c0_3 = arith.constant 0 : index
    %c0_4 = arith.constant 0 : index
    %3 = vector.load %arg3[%c0_3, %c0_4] : memref<1x128xf32, #tpu.memory_space<vmem>>, vector<1x128xf32>
    %4 = vector.broadcast %3 : vector<1x128xf32> to vector<16x128xf32>
    %5 = arith.addf %2, %4 : vector<16x128xf32>
    %c0_5 = arith.constant 0 : index
    %c0_6 = arith.constant 0 : index
    %6 = vector.load %arg7[%c0_5, %c0_6] : memref<16x128xf32, #tpu.memory_space<vmem>>, vector<16x128xf32>
    tpu.vector_store %arg7[%c0_5, %c0_6], %5 {strides = array<i32>} : memref<16x128xf32, #tpu.memory_space<vmem>>, vector<16x128xf32>,
    %c0_7 = arith.constant 0 : index
    %c0_8 = arith.constant 0 : index
    %7 = vector.load %arg2[%c0_7, %c0_8] : memref<32x128xf32, #tpu.memory_space<vmem>>, vector<32x128xf32>
    %cst_9 = arith.constant 0.000000e+00 : f32
    %8 = vector.broadcast %cst_9 : f32 to vector<2x32xf32>
    %cst_10 = arith.constant 0.000000e+00 : f32
    %9 = vector.broadcast %cst_10 : f32 to vector<2x32xf32>
    %c0_11 = arith.constant 0 : index
    %c0_12 = arith.constant 0 : index
    %10 = vector.load %arg7[%c0_11, %c0_12] : memref<16x128xf32, #tpu.memory_space<vmem>>, vector<2x128xf32>
    %cst_13 = arith.constant dense<0.000000e+00> : vector<2x128xf32>
    %11 = tpu.matmul %8, %7, %cst_13 {dimension_numbers = #tpu.dot_dimension_numbers<[1], [0], [0], [1], [0, 0, 1, 1], [], []>} : vector<2x32xf32>, vector<32x128xf32>, vector<2x128xf32> -> vector<2x128xf32>
    %12 = arith.addf %10, %11 : vector<2x128xf32>
    %13 = vector.extract_strided_slice %12 {offsets = [0, 0], sizes = [2, 32], strides = [1, 1]} : vector<2x128xf32> to vector<2x32xf32>
    %14 = arith.negf %13 : vector<2x32xf32>
    %15 = math.exp %14 : vector<2x32xf32>
    %cst_14 = arith.constant 1.000000e+00 : f32
    %16 = vector.broadcast %cst_14 : f32 to vector<2x32xf32>
    %17 = arith.addf %16, %15 : vector<2x32xf32>
    %18 = arith.divf %16, %17 : vector<2x32xf32>
    %19 = vector.extract_strided_slice %12 {offsets = [0, 32], sizes = [2, 32], strides = [1, 1]} : vector<2x128xf32> to vector<2x32xf32>
    %20 = arith.negf %19 : vector<2x32xf32>
    %21 = math.exp %20 : vector<2x32xf32>
    %cst_15 = arith.constant 1.000000e+00 : f32
    %22 = vector.broadcast %cst_15 : f32 to vector<2x32xf32>
    %23 = arith.addf %22, %21 : vector<2x32xf32>
    %24 = arith.divf %22, %23 : vector<2x32xf32>
    %25 = vector.extract_strided_slice %12 {offsets = [0, 64], sizes = [2, 32], strides = [1, 1]} : vector<2x128xf32> to vector<2x32xf32>
    %26 = math.tanh %25 : vector<2x32xf32>
    %27 = vector.extract_strided_slice %12 {offsets = [0, 96], sizes = [2, 32], strides = [1, 1]} : vector<2x128xf32> to vector<2x32xf32>
    %28 = arith.negf %27 : vector<2x32xf32>
    %29 = math.exp %28 : vector<2x32xf32>
    %cst_16 = arith.constant 1.000000e+00 : f32
    %30 = vector.broadcast %cst_16 : f32 to vector<2x32xf32>
    %31 = arith.addf %30, %29 : vector<2x32xf32>
    %32 = arith.divf %30, %31 : vector<2x32xf32>
    %33 = arith.mulf %24, %9 : vector<2x32xf32>
    %34 = arith.mulf %18, %26 : vector<2x32xf32>
    %35 = arith.addf %33, %34 : vector<2x32xf32>
    %36 = math.tanh %35 : vector<2x32xf32>
    %37 = arith.mulf %32, %36 : vector<2x32xf32>
    %c0_17 = arith.constant 0 : index
    %c0_18 = arith.constant 0 : index
    %38 = vector.load %arg8[%c0_17, %c0_18] : memref<16x32xf32, #tpu.memory_space<vmem>>, vector<2x32xf32>
    tpu.vector_store %arg8[%c0_17, %c0_18], %37 {strides = array<i32>} : memref<16x32xf32, #tpu.memory_space<vmem>>, vector<2x32xf32>,
    %c2 = arith.constant 2 : index
    %c0_19 = arith.constant 0 : index
    %39 = vector.load %arg7[%c2, %c0_19] : memref<16x128xf32, #tpu.memory_space<vmem>>, vector<2x128xf32>
    %cst_20 = arith.constant dense<0.000000e+00> : vector<2x128xf32>
    %40 = tpu.matmul %37, %7, %cst_20 {dimension_numbers = #tpu.dot_dimension_numbers<[1], [0], [0], [1], [0, 0, 1, 1], [], []>} : vector<2x32xf32>, vector<32x128xf32>, vector<2x128xf32> -> vector<2x128xf32>
    %41 = arith.addf %39, %40 : vector<2x128xf32>
    %42 = vector.extract_strided_slice %41 {offsets = [0, 0], sizes = [2, 32], strides = [1, 1]} : vector<2x128xf32> to vector<2x32xf32>
    %43 = arith.negf %42 : vector<2x32xf32>
    %44 = math.exp %43 : vector<2x32xf32>
    %cst_21 = arith.constant 1.000000e+00 : f32
    %45 = vector.broadcast %cst_21 : f32 to vector<2x32xf32>
    %46 = arith.addf %45, %44 : vector<2x32xf32>
    %47 = arith.divf %45, %46 : vector<2x32xf32>
    %48 = vector.extract_strided_slice %41 {offsets = [0, 32], sizes = [2, 32], strides = [1, 1]} : vector<2x128xf32> to vector<2x32xf32>
    %49 = arith.negf %48 : vector<2x32xf32>
    %50 = math.exp %49 : vector<2x32xf32>
    %cst_22 = arith.constant 1.000000e+00 : f32
    %51 = vector.broadcast %cst_22 : f32 to vector<2x32xf32>
    %52 = arith.addf %51, %50 : vector<2x32xf32>
    %53 = arith.divf %51, %52 : vector<2x32xf32>
    %54 = vector.extract_strided_slice %41 {offsets = [0, 64], sizes = [2, 32], strides = [1, 1]} : vector<2x128xf32> to vector<2x32xf32>
    %55 = math.tanh %54 : vector<2x32xf32>
    %56 = vector.extract_strided_slice %41 {offsets = [0, 96], sizes = [2, 32], strides = [1, 1]} : vector<2x128xf32> to vector<2x32xf32>
    %57 = arith.negf %56 : vector<2x32xf32>
    %58 = math.exp %57 : vector<2x32xf32>
    %cst_23 = arith.constant 1.000000e+00 : f32
    %59 = vector.broadcast %cst_23 : f32 to vector<2x32xf32>
    %60 = arith.addf %59, %58 : vector<2x32xf32>
    %61 = arith.divf %59, %60 : vector<2x32xf32>
    %62 = arith.mulf %53, %35 : vector<2x32xf32>
    %63 = arith.mulf %47, %55 : vector<2x32xf32>
    %64 = arith.addf %62, %63 : vector<2x32xf32>
    %65 = math.tanh %64 : vector<2x32xf32>
    %66 = arith.mulf %61, %65 : vector<2x32xf32>
    %c2_24 = arith.constant 2 : index
    %c0_25 = arith.constant 0 : index
    %67 = vector.load %arg8[%c2_24, %c0_25] : memref<16x32xf32, #tpu.memory_space<vmem>>, vector<2x32xf32>
    tpu.vector_store %arg8[%c2_24, %c0_25], %66 {strides = array<i32>} : memref<16x32xf32, #tpu.memory_space<vmem>>, vector<2x32xf32>,
    %c4 = arith.constant 4 : index
    %c0_26 = arith.constant 0 : index
    %68 = vector.load %arg7[%c4, %c0_26] : memref<16x128xf32, #tpu.memory_space<vmem>>, vector<2x128xf32>
    %cst_27 = arith.constant dense<0.000000e+00> : vector<2x128xf32>
    %69 = tpu.matmul %66, %7, %cst_27 {dimension_numbers = #tpu.dot_dimension_numbers<[1], [0], [0], [1], [0, 0, 1, 1], [], []>} : vector<2x32xf32>, vector<32x128xf32>, vector<2x128xf32> -> vector<2x128xf32>
    %70 = arith.addf %68, %69 : vector<2x128xf32>
    %71 = vector.extract_strided_slice %70 {offsets = [0, 0], sizes = [2, 32], strides = [1, 1]} : vector<2x128xf32> to vector<2x32xf32>
    %72 = arith.negf %71 : vector<2x32xf32>
    %73 = math.exp %72 : vector<2x32xf32>
    %cst_28 = arith.constant 1.000000e+00 : f32
    %74 = vector.broadcast %cst_28 : f32 to vector<2x32xf32>
    %75 = arith.addf %74, %73 : vector<2x32xf32>
    %76 = arith.divf %74, %75 : vector<2x32xf32>
    %77 = vector.extract_strided_slice %70 {offsets = [0, 32], sizes = [2, 32], strides = [1, 1]} : vector<2x128xf32> to vector<2x32xf32>
    %78 = arith.negf %77 : vector<2x32xf32>
    %79 = math.exp %78 : vector<2x32xf32>
    %cst_29 = arith.constant 1.000000e+00 : f32
    %80 = vector.broadcast %cst_29 : f32 to vector<2x32xf32>
    %81 = arith.addf %80, %79 : vector<2x32xf32>
    %82 = arith.divf %80, %81 : vector<2x32xf32>
    %83 = vector.extract_strided_slice %70 {offsets = [0, 64], sizes = [2, 32], strides = [1, 1]} : vector<2x128xf32> to vector<2x32xf32>
    %84 = math.tanh %83 : vector<2x32xf32>
    %85 = vector.extract_strided_slice %70 {offsets = [0, 96], sizes = [2, 32], strides = [1, 1]} : vector<2x128xf32> to vector<2x32xf32>
    %86 = arith.negf %85 : vector<2x32xf32>
    %87 = math.exp %86 : vector<2x32xf32>
    %cst_30 = arith.constant 1.000000e+00 : f32
    %88 = vector.broadcast %cst_30 : f32 to vector<2x32xf32>
    %89 = arith.addf %88, %87 : vector<2x32xf32>
    %90 = arith.divf %88, %89 : vector<2x32xf32>
    %91 = arith.mulf %82, %64 : vector<2x32xf32>
    %92 = arith.mulf %76, %84 : vector<2x32xf32>
    %93 = arith.addf %91, %92 : vector<2x32xf32>
    %94 = math.tanh %93 : vector<2x32xf32>
    %95 = arith.mulf %90, %94 : vector<2x32xf32>
    %c4_31 = arith.constant 4 : index
    %c0_32 = arith.constant 0 : index
    %96 = vector.load %arg8[%c4_31, %c0_32] : memref<16x32xf32, #tpu.memory_space<vmem>>, vector<2x32xf32>
    tpu.vector_store %arg8[%c4_31, %c0_32], %95 {strides = array<i32>} : memref<16x32xf32, #tpu.memory_space<vmem>>, vector<2x32xf32>,
    %c6 = arith.constant 6 : index
    %c0_33 = arith.constant 0 : index
    %97 = vector.load %arg7[%c6, %c0_33] : memref<16x128xf32, #tpu.memory_space<vmem>>, vector<2x128xf32>
    %cst_34 = arith.constant dense<0.000000e+00> : vector<2x128xf32>
    %98 = tpu.matmul %95, %7, %cst_34 {dimension_numbers = #tpu.dot_dimension_numbers<[1], [0], [0], [1], [0, 0, 1, 1], [], []>} : vector<2x32xf32>, vector<32x128xf32>, vector<2x128xf32> -> vector<2x128xf32>
    %99 = arith.addf %97, %98 : vector<2x128xf32>
    %100 = vector.extract_strided_slice %99 {offsets = [0, 0], sizes = [2, 32], strides = [1, 1]} : vector<2x128xf32> to vector<2x32xf32>
    %101 = arith.negf %100 : vector<2x32xf32>
    %102 = math.exp %101 : vector<2x32xf32>
    %cst_35 = arith.constant 1.000000e+00 : f32
    %103 = vector.broadcast %cst_35 : f32 to vector<2x32xf32>
    %104 = arith.addf %103, %102 : vector<2x32xf32>
    %105 = arith.divf %103, %104 : vector<2x32xf32>
    %106 = vector.extract_strided_slice %99 {offsets = [0, 32], sizes = [2, 32], strides = [1, 1]} : vector<2x128xf32> to vector<2x32xf32>
    %107 = arith.negf %106 : vector<2x32xf32>
    %108 = math.exp %107 : vector<2x32xf32>
    %cst_36 = arith.constant 1.000000e+00 : f32
    %109 = vector.broadcast %cst_36 : f32 to vector<2x32xf32>
    %110 = arith.addf %109, %108 : vector<2x32xf32>
    %111 = arith.divf %109, %110 : vector<2x32xf32>
    %112 = vector.extract_strided_slice %99 {offsets = [0, 64], sizes = [2, 32], strides = [1, 1]} : vector<2x128xf32> to vector<2x32xf32>
    %113 = math.tanh %112 : vector<2x32xf32>
    %114 = vector.extract_strided_slice %99 {offsets = [0, 96], sizes = [2, 32], strides = [1, 1]} : vector<2x128xf32> to vector<2x32xf32>
    %115 = arith.negf %114 : vector<2x32xf32>
    %116 = math.exp %115 : vector<2x32xf32>
    %cst_37 = arith.constant 1.000000e+00 : f32
    %117 = vector.broadcast %cst_37 : f32 to vector<2x32xf32>
    %118 = arith.addf %117, %116 : vector<2x32xf32>
    %119 = arith.divf %117, %118 : vector<2x32xf32>
    %120 = arith.mulf %111, %93 : vector<2x32xf32>
    %121 = arith.mulf %105, %113 : vector<2x32xf32>
    %122 = arith.addf %120, %121 : vector<2x32xf32>
    %123 = math.tanh %122 : vector<2x32xf32>
    %124 = arith.mulf %119, %123 : vector<2x32xf32>
    %c6_38 = arith.constant 6 : index
    %c0_39 = arith.constant 0 : index
    %125 = vector.load %arg8[%c6_38, %c0_39] : memref<16x32xf32, #tpu.memory_space<vmem>>, vector<2x32xf32>
    tpu.vector_store %arg8[%c6_38, %c0_39], %124 {strides = array<i32>} : memref<16x32xf32, #tpu.memory_space<vmem>>, vector<2x32xf32>,
    %c8 = arith.constant 8 : index
    %c0_40 = arith.constant 0 : index
    %126 = vector.load %arg7[%c8, %c0_40] : memref<16x128xf32, #tpu.memory_space<vmem>>, vector<2x128xf32>
    %cst_41 = arith.constant dense<0.000000e+00> : vector<2x128xf32>
    %127 = tpu.matmul %124, %7, %cst_41 {dimension_numbers = #tpu.dot_dimension_numbers<[1], [0], [0], [1], [0, 0, 1, 1], [], []>} : vector<2x32xf32>, vector<32x128xf32>, vector<2x128xf32> -> vector<2x128xf32>
    %128 = arith.addf %126, %127 : vector<2x128xf32>
    %129 = vector.extract_strided_slice %128 {offsets = [0, 0], sizes = [2, 32], strides = [1, 1]} : vector<2x128xf32> to vector<2x32xf32>
    %130 = arith.negf %129 : vector<2x32xf32>
    %131 = math.exp %130 : vector<2x32xf32>
    %cst_42 = arith.constant 1.000000e+00 : f32
    %132 = vector.broadcast %cst_42 : f32 to vector<2x32xf32>
    %133 = arith.addf %132, %131 : vector<2x32xf32>
    %134 = arith.divf %132, %133 : vector<2x32xf32>
    %135 = vector.extract_strided_slice %128 {offsets = [0, 32], sizes = [2, 32], strides = [1, 1]} : vector<2x128xf32> to vector<2x32xf32>
    %136 = arith.negf %135 : vector<2x32xf32>
    %137 = math.exp %136 : vector<2x32xf32>
    %cst_43 = arith.constant 1.000000e+00 : f32
    %138 = vector.broadcast %cst_43 : f32 to vector<2x32xf32>
    %139 = arith.addf %138, %137 : vector<2x32xf32>
    %140 = arith.divf %138, %139 : vector<2x32xf32>
    %141 = vector.extract_strided_slice %128 {offsets = [0, 64], sizes = [2, 32], strides = [1, 1]} : vector<2x128xf32> to vector<2x32xf32>
    %142 = math.tanh %141 : vector<2x32xf32>
    %143 = vector.extract_strided_slice %128 {offsets = [0, 96], sizes = [2, 32], strides = [1, 1]} : vector<2x128xf32> to vector<2x32xf32>
    %144 = arith.negf %143 : vector<2x32xf32>
    %145 = math.exp %144 : vector<2x32xf32>
    %cst_44 = arith.constant 1.000000e+00 : f32
    %146 = vector.broadcast %cst_44 : f32 to vector<2x32xf32>
    %147 = arith.addf %146, %145 : vector<2x32xf32>
    %148 = arith.divf %146, %147 : vector<2x32xf32>
    %149 = arith.mulf %140, %122 : vector<2x32xf32>
    %150 = arith.mulf %134, %142 : vector<2x32xf32>
    %151 = arith.addf %149, %150 : vector<2x32xf32>
    %152 = math.tanh %151 : vector<2x32xf32>
    %153 = arith.mulf %148, %152 : vector<2x32xf32>
    %c8_45 = arith.constant 8 : index
    %c0_46 = arith.constant 0 : index
    %154 = vector.load %arg8[%c8_45, %c0_46] : memref<16x32xf32, #tpu.memory_space<vmem>>, vector<2x32xf32>
    tpu.vector_store %arg8[%c8_45, %c0_46], %153 {strides = array<i32>} : memref<16x32xf32, #tpu.memory_space<vmem>>, vector<2x32xf32>,
    %c10 = arith.constant 10 : index
    %c0_47 = arith.constant 0 : index
    %155 = vector.load %arg7[%c10, %c0_47] : memref<16x128xf32, #tpu.memory_space<vmem>>, vector<2x128xf32>
    %cst_48 = arith.constant dense<0.000000e+00> : vector<2x128xf32>
    %156 = tpu.matmul %153, %7, %cst_48 {dimension_numbers = #tpu.dot_dimension_numbers<[1], [0], [0], [1], [0, 0, 1, 1], [], []>} : vector<2x32xf32>, vector<32x128xf32>, vector<2x128xf32> -> vector<2x128xf32>
    %157 = arith.addf %155, %156 : vector<2x128xf32>
    %158 = vector.extract_strided_slice %157 {offsets = [0, 0], sizes = [2, 32], strides = [1, 1]} : vector<2x128xf32> to vector<2x32xf32>
    %159 = arith.negf %158 : vector<2x32xf32>
    %160 = math.exp %159 : vector<2x32xf32>
    %cst_49 = arith.constant 1.000000e+00 : f32
    %161 = vector.broadcast %cst_49 : f32 to vector<2x32xf32>
    %162 = arith.addf %161, %160 : vector<2x32xf32>
    %163 = arith.divf %161, %162 : vector<2x32xf32>
    %164 = vector.extract_strided_slice %157 {offsets = [0, 32], sizes = [2, 32], strides = [1, 1]} : vector<2x128xf32> to vector<2x32xf32>
    %165 = arith.negf %164 : vector<2x32xf32>
    %166 = math.exp %165 : vector<2x32xf32>
    %cst_50 = arith.constant 1.000000e+00 : f32
    %167 = vector.broadcast %cst_50 : f32 to vector<2x32xf32>
    %168 = arith.addf %167, %166 : vector<2x32xf32>
    %169 = arith.divf %167, %168 : vector<2x32xf32>
    %170 = vector.extract_strided_slice %157 {offsets = [0, 64], sizes = [2, 32], strides = [1, 1]} : vector<2x128xf32> to vector<2x32xf32>
    %171 = math.tanh %170 : vector<2x32xf32>
    %172 = vector.extract_strided_slice %157 {offsets = [0, 96], sizes = [2, 32], strides = [1, 1]} : vector<2x128xf32> to vector<2x32xf32>
    %173 = arith.negf %172 : vector<2x32xf32>
    %174 = math.exp %173 : vector<2x32xf32>
    %cst_51 = arith.constant 1.000000e+00 : f32
    %175 = vector.broadcast %cst_51 : f32 to vector<2x32xf32>
    %176 = arith.addf %175, %174 : vector<2x32xf32>
    %177 = arith.divf %175, %176 : vector<2x32xf32>
    %178 = arith.mulf %169, %151 : vector<2x32xf32>
    %179 = arith.mulf %163, %171 : vector<2x32xf32>
    %180 = arith.addf %178, %179 : vector<2x32xf32>
    %181 = math.tanh %180 : vector<2x32xf32>
    %182 = arith.mulf %177, %181 : vector<2x32xf32>
    %c10_52 = arith.constant 10 : index
    %c0_53 = arith.constant 0 : index
    %183 = vector.load %arg8[%c10_52, %c0_53] : memref<16x32xf32, #tpu.memory_space<vmem>>, vector<2x32xf32>
    tpu.vector_store %arg8[%c10_52, %c0_53], %182 {strides = array<i32>} : memref<16x32xf32, #tpu.memory_space<vmem>>, vector<2x32xf32>,
    %c12 = arith.constant 12 : index
    %c0_54 = arith.constant 0 : index
    %184 = vector.load %arg7[%c12, %c0_54] : memref<16x128xf32, #tpu.memory_space<vmem>>, vector<2x128xf32>
    %cst_55 = arith.constant dense<0.000000e+00> : vector<2x128xf32>
    %185 = tpu.matmul %182, %7, %cst_55 {dimension_numbers = #tpu.dot_dimension_numbers<[1], [0], [0], [1], [0, 0, 1, 1], [], []>} : vector<2x32xf32>, vector<32x128xf32>, vector<2x128xf32> -> vector<2x128xf32>
    %186 = arith.addf %184, %185 : vector<2x128xf32>
    %187 = vector.extract_strided_slice %186 {offsets = [0, 0], sizes = [2, 32], strides = [1, 1]} : vector<2x128xf32> to vector<2x32xf32>
    %188 = arith.negf %187 : vector<2x32xf32>
    %189 = math.exp %188 : vector<2x32xf32>
    %cst_56 = arith.constant 1.000000e+00 : f32
    %190 = vector.broadcast %cst_56 : f32 to vector<2x32xf32>
    %191 = arith.addf %190, %189 : vector<2x32xf32>
    %192 = arith.divf %190, %191 : vector<2x32xf32>
    %193 = vector.extract_strided_slice %186 {offsets = [0, 32], sizes = [2, 32], strides = [1, 1]} : vector<2x128xf32> to vector<2x32xf32>
    %194 = arith.negf %193 : vector<2x32xf32>
    %195 = math.exp %194 : vector<2x32xf32>
    %cst_57 = arith.constant 1.000000e+00 : f32
    %196 = vector.broadcast %cst_57 : f32 to vector<2x32xf32>
    %197 = arith.addf %196, %195 : vector<2x32xf32>
    %198 = arith.divf %196, %197 : vector<2x32xf32>
    %199 = vector.extract_strided_slice %186 {offsets = [0, 64], sizes = [2, 32], strides = [1, 1]} : vector<2x128xf32> to vector<2x32xf32>
    %200 = math.tanh %199 : vector<2x32xf32>
    %201 = vector.extract_strided_slice %186 {offsets = [0, 96], sizes = [2, 32], strides = [1, 1]} : vector<2x128xf32> to vector<2x32xf32>
    %202 = arith.negf %201 : vector<2x32xf32>
    %203 = math.exp %202 : vector<2x32xf32>
    %cst_58 = arith.constant 1.000000e+00 : f32
    %204 = vector.broadcast %cst_58 : f32 to vector<2x32xf32>
    %205 = arith.addf %204, %203 : vector<2x32xf32>
    %206 = arith.divf %204, %205 : vector<2x32xf32>
    %207 = arith.mulf %198, %180 : vector<2x32xf32>
    %208 = arith.mulf %192, %200 : vector<2x32xf32>
    %209 = arith.addf %207, %208 : vector<2x32xf32>
    %210 = math.tanh %209 : vector<2x32xf32>
    %211 = arith.mulf %206, %210 : vector<2x32xf32>
    %c12_59 = arith.constant 12 : index
    %c0_60 = arith.constant 0 : index
    %212 = vector.load %arg8[%c12_59, %c0_60] : memref<16x32xf32, #tpu.memory_space<vmem>>, vector<2x32xf32>
    tpu.vector_store %arg8[%c12_59, %c0_60], %211 {strides = array<i32>} : memref<16x32xf32, #tpu.memory_space<vmem>>, vector<2x32xf32>,
    %c14 = arith.constant 14 : index
    %c0_61 = arith.constant 0 : index
    %213 = vector.load %arg7[%c14, %c0_61] : memref<16x128xf32, #tpu.memory_space<vmem>>, vector<2x128xf32>
    %cst_62 = arith.constant dense<0.000000e+00> : vector<2x128xf32>
    %214 = tpu.matmul %211, %7, %cst_62 {dimension_numbers = #tpu.dot_dimension_numbers<[1], [0], [0], [1], [0, 0, 1, 1], [], []>} : vector<2x32xf32>, vector<32x128xf32>, vector<2x128xf32> -> vector<2x128xf32>
    %215 = arith.addf %213, %214 : vector<2x128xf32>
    %216 = vector.extract_strided_slice %215 {offsets = [0, 0], sizes = [2, 32], strides = [1, 1]} : vector<2x128xf32> to vector<2x32xf32>
    %217 = arith.negf %216 : vector<2x32xf32>
    %218 = math.exp %217 : vector<2x32xf32>
    %cst_63 = arith.constant 1.000000e+00 : f32
    %219 = vector.broadcast %cst_63 : f32 to vector<2x32xf32>
    %220 = arith.addf %219, %218 : vector<2x32xf32>
    %221 = arith.divf %219, %220 : vector<2x32xf32>
    %222 = vector.extract_strided_slice %215 {offsets = [0, 32], sizes = [2, 32], strides = [1, 1]} : vector<2x128xf32> to vector<2x32xf32>
    %223 = arith.negf %222 : vector<2x32xf32>
    %224 = math.exp %223 : vector<2x32xf32>
    %cst_64 = arith.constant 1.000000e+00 : f32
    %225 = vector.broadcast %cst_64 : f32 to vector<2x32xf32>
    %226 = arith.addf %225, %224 : vector<2x32xf32>
    %227 = arith.divf %225, %226 : vector<2x32xf32>
    %228 = vector.extract_strided_slice %215 {offsets = [0, 64], sizes = [2, 32], strides = [1, 1]} : vector<2x128xf32> to vector<2x32xf32>
    %229 = math.tanh %228 : vector<2x32xf32>
    %230 = vector.extract_strided_slice %215 {offsets = [0, 96], sizes = [2, 32], strides = [1, 1]} : vector<2x128xf32> to vector<2x32xf32>
    %231 = arith.negf %230 : vector<2x32xf32>
    %232 = math.exp %231 : vector<2x32xf32>
    %cst_65 = arith.constant 1.000000e+00 : f32
    %233 = vector.broadcast %cst_65 : f32 to vector<2x32xf32>
    %234 = arith.addf %233, %232 : vector<2x32xf32>
    %235 = arith.divf %233, %234 : vector<2x32xf32>
    %236 = arith.mulf %227, %209 : vector<2x32xf32>
    %237 = arith.mulf %221, %229 : vector<2x32xf32>
    %238 = arith.addf %236, %237 : vector<2x32xf32>
    %239 = math.tanh %238 : vector<2x32xf32>
    %240 = arith.mulf %235, %239 : vector<2x32xf32>
    %c14_66 = arith.constant 14 : index
    %c0_67 = arith.constant 0 : index
    %241 = vector.load %arg8[%c14_66, %c0_67] : memref<16x32xf32, #tpu.memory_space<vmem>>, vector<2x32xf32>
    tpu.vector_store %arg8[%c14_66, %c0_67], %240 {strides = array<i32>} : memref<16x32xf32, #tpu.memory_space<vmem>>, vector<2x32xf32>,
    %c0_68 = arith.constant 0 : index
    %c0_69 = arith.constant 0 : index
    %242 = vector.load %arg8[%c0_68, %c0_69] : memref<16x32xf32, #tpu.memory_space<vmem>>, vector<16x32xf32>
    %c0_70 = arith.constant 0 : index
    %c0_71 = arith.constant 0 : index
    %243 = vector.load %arg4[%c0_70, %c0_71] : memref<32x1xf32, #tpu.memory_space<vmem>>, vector<32x1xf32>
    %cst_72 = arith.constant dense<0.000000e+00> : vector<16x1xf32>
    %244 = tpu.matmul %242, %243, %cst_72 {dimension_numbers = #tpu.dot_dimension_numbers<[1], [0], [0], [1], [0, 0, 1, 1], [], []>} : vector<16x32xf32>, vector<32x1xf32>, vector<16x1xf32> -> vector<16x1xf32>
    %c0_73 = arith.constant 0 : index
    %c0_74 = arith.constant 0 : index
    %245 = memref.load %arg5[%c0_73, %c0_74] : memref<1x1xf32, #tpu.memory_space<smem>>
    %246 = vector.broadcast %245 : f32 to vector<16x1xf32>
    %247 = arith.addf %244, %246 : vector<16x1xf32>
    %c0_75 = arith.constant 0 : index
    %c0_76 = arith.constant 0 : index
    %248 = vector.load %arg6[%c0_75, %c0_76] : memref<16x1xf32, #tpu.memory_space<vmem>>, vector<16x1xf32>
    tpu.vector_store %arg6[%c0_75, %c0_76], %247 {strides = array<i32>} : memref<16x1xf32, #tpu.memory_space<vmem>>, vector<16x1xf32>,
    return
  }
}

</mosaic_0001>

<bundles_post_ra>
// kernel: tpu_custom_call.1
= control target key start
LH: loop header
LB: loop body
LE: loop exit
PB: predicated region body
PF: predicated region fallthrough
CT: control target
= control target key end

     0   :  { %12 = vsyncpa [#allocation6], 0  ;;  %s1641_s0 = inlined_call_operand.hbm [shape: f32[16,16], index: 0, kind: input, shape index: {}]   ;;  %s1642_s1 = inlined_call_operand.hbm [shape: f32[16,128], index: 1, kind: input, shape index: {}]   ;;  %s1643_s2 = inlined_call_operand.vmem [shape: f32[32,128], index: 2, kind: input, shape index: {}]   ;;  %s1644_s3 = inlined_call_operand.vmem [shape: f32[1,128], index: 3, kind: input, shape index: {}]   ;;  %s1645_s4 = inlined_call_operand.vmem [shape: f32[32,1], index: 4, kind: input, shape index: {}]   ;;  %s1646_s5 = inlined_call_operand.<no memory space> [shape: f32[1,1], index: 5, kind: input, shape index: {}]   ;;  %s1647_s6 = inlined_call_operand.vmem [shape: f32[16,1], index: 6, kind: output, shape index: {}]  }
   0x1   :  { %13 = vsyncpa [#allocation8], 0  ;;  %s1433_s21 = smov [#allocation5]   ;;  %s1385_s25 = scalar_lea.hbm %s1641_s0, 256 }
   0x2   :  { %s19_s22 = sshll.u32 %s1433_s21, 4  ;;  %p1386_p0 = scmp.ne.s32.totalorder %s1641_s0, %s1385_s25  ;;  %s20_s22 = int_to_ptr.vmem [resolvable:$true] %s19_s22 }
   0x3   :  { %p1389_p1 = scmp.lt.u32.totalorder %s1385_s25, %s1641_s0 }
   0x5   :  { %p1391_p2 = pnand %p1389_p1, %p1386_p0 }
   0x7   :  { %1394 = shalt.err (!%p1391_p2)
}
   0x8   :  { %s1395_s30 = scalar_lea.vmem %s20_s22, 256  ;;  %p1400_p4 = scmp.lt.s32.totalorder %s20_s22, %s20_s22 }
   0x9   :  { %p1396_p3 = scmp.ne.s32.totalorder %s20_s22, %s1395_s30  ;;  %p1401_p5 = scmp.lt.s32.totalorder %s1395_s30, %s1395_s30 }
   0xb   :  { %p1402_p6 = por %p1401_p5, %p1400_p4 }
   0xd   :  { %p1403_p7 = pnand %p1402_p6, %p1396_p3 }
   0xf   :  { %1406 = shalt.err (!%p1403_p7)
}
  0x10   :  { %s1434_s7 = smov 128   ;;  %s1435_s8 = smov 8  }
  0x11   :  { %25 = dma.hbm_to_vmem [thread:$0]  %s1641_s0, 256, %s20_s22, [#allocation6], %s1434_s7, %s1434_s7, %s1435_s8  }
  0x12   :  { %s1436_s11 = smov [#allocation7]   ;;  %s1407_s15 = scalar_lea.hbm %s1642_s1, 256 }
  0x13   :  { %s31_s12 = sshll.u32 %s1436_s11, 4  ;;  %p1408_p8 = scmp.ne.s32.totalorder %s1642_s1, %s1407_s15  ;;  %s32_s12 = int_to_ptr.vmem [resolvable:$true] %s31_s12 }
  0x14   :  { %p1411_p9 = scmp.lt.u32.totalorder %s1407_s15, %s1642_s1 }
  0x16   :  { %p1413_p10 = pnand %p1411_p9, %p1408_p8 }
  0x18   :  { %1416 = shalt.err (!%p1413_p10)
}
  0x19   :  { %s1417_s20 = scalar_lea.vmem %s32_s12, 256  ;;  %p1422_p12 = scmp.lt.s32.totalorder %s32_s12, %s32_s12 }
  0x1a   :  { %p1418_p11 = scmp.ne.s32.totalorder %s32_s12, %s1417_s20  ;;  %p1423_p13 = scmp.lt.s32.totalorder %s1417_s20, %s1417_s20 }
  0x1c   :  { %p1424_p0 = por %p1423_p13, %p1422_p12 }
  0x1e   :  { %p1425_p1 = pnand %p1424_p0, %p1418_p11 }
  0x20   :  { %1428 = shalt.err (!%p1425_p1)
}
  0x21   :  { %37 = dma.hbm_to_vmem [thread:$0]  %s1642_s1, 256, %s32_s12, [#allocation8], %s1434_s7, %s1434_s7, %s1435_s8  }
  0x22   :  { %1429 = dma.done.wait [#allocation6], 256  }
  0x23   :  { %1430 = vsyncadd [#allocation6], 4294967040 }
  0x24   :  { %1431 = dma.done.wait [#allocation8], 256  }
  0x25   :  { %1432 = vsyncadd [#allocation8], 4294967040  ;;  %v1437_v0 = vmov 0.0|0.0   ;;  %vm1438_vm0 = vmmov 0   ;;  %v1439_v1 = vmov 0.0   ;;  %vm63_vm1 = vcmask 130048  }
  0x26   :  { %1256 = vmatprep.subr.bf16.mxu1 %v1437_v0  ;;  %1161 = vmatprep.mubr.msk.f32.mxu1 %vm1438_vm0, %v1439_v1  ;;  %v54_v2 = vld [vmem:[#allocation7] sm:$0xff]  ;;  %v55_v3 = vld [vmem:[#allocation7 + $0x8] sm:$0xff]  ;;  %v52_v4 = vld [vmem:[#allocation5] sm:$0xff]  ;;  %s1440_s30 = smov 64   ;;  %vm255_vm2 = vcmask 254976   ;;  %vm152_vm3 = vcmask 261120  }
  0x27   :  { %v1252_v5 = vpack.c.bf16 %v55_v3, %v54_v2  ;;  %1150 = vmatprep.mubr.msk.f32.mxu0 %vm63_vm1, %v52_v4  ;;  %v147_v6 = vld [vmem:[%s1643_s2] sm:$0xff]  ;;  %v148_v7 = vld [vmem:[%s1643_s2 + $0x8] sm:$0xff]  ;;  %v149_v9 = vld [vmem:[%s1643_s2 + $0x10] sm:$0xff]  ;;  %vm1067_vm4 = vcmask 7168  }
  0x28   :  { %v1511_v8 = vpack.c.bf16 %v148_v7, %v147_v6  ;;  %v150_v10 = vld [vmem:[%s1643_s2 + $0x18] sm:$0xff]  ;;  %v53_v11 = vld [vmem:[#allocation5 + $0x8] sm:$0xff]  ;;  %v1076_v13 = vld [vmem:[%s1644_s3] ss:$0 sm:$0xff]  ;;  %s1441_s3 = smov 32  }
  0x29   :  { %1253 = vmatprep.subr.bf16.mxu0 %v1252_v5  ;;  %v1520_v12 = vpack.c.bf16 %v150_v10, %v149_v9 }
  0x2a   :  { %1255 = vmatpush3.bf16.msra.mxu0 %v1252_v5  ;;  %1258 = vmatpush3.bf16.msra.mxu1 %v1511_v8 }
  0x2b   :  { %1259 = vmatprep.subr.bf16.mxu1 %v1437_v0  ;;  %1262 = vmatprep.subr.bf16.mxu0 %v1437_v0 }
  0x2d   :  { %1151 = vmatmul.mubr.msk.f32.vlgmr.msra.gmra.mrb[0].mxu0 %vm63_vm1, %v53_v11 }
  0x2e   :  { %1261 = vmatpush3.bf16.msra.mxu1 %v1520_v12  ;;  %1264 = vmatpush3.bf16.msra.mxu0 %v1511_v8 }
  0x2f   :  { %1265 = vmatprep.subr.bf16.mxu0 %v1437_v0  ;;  %1172 = vmatprep.mubr.msk.f32.mxu0 %vm1438_vm0, %v1439_v1 }
  0x30   :  { %1268 = vmatprep.subr.bf16.mxu1 %v1437_v0 }
  0x31   :  { %1162 = vmatmul.mubr.f32.vlgmr.msra.gmra.mrb[0].mxu1 %v1439_v1 }
  0x32   :  { %1267 = vmatpush3.bf16.msra.mxu0 %v1520_v12  ;;  %1270 = vmatpush3.bf16.msra.mxu1 %v1511_v8 }
  0x33   :  { %1271 = vmatprep.subr.bf16.mxu1 %v1437_v0  ;;  %1183 = vmatprep.mubr.msk.f32.mxu1 %vm1438_vm0, %v1439_v1 }
  0x34   :  { %1274 = vmatprep.subr.bf16.mxu0 %v1437_v0 }
  0x36   :  { %1273 = vmatpush3.bf16.msra.mxu1 %v1520_v12 }
  0x37   :  { %1280 = vmatprep.subr.bf16.mxu1 %v1437_v0 }
 0x100   :  { %v1152_v14 = vpop.f32.mrb[0].mxu0 }
 0x101   :  { %v142_v15 = vadd.f32 %v1152_v14, %v1076_v13  ;;  %v136_v16 = vpop.f32.mrb[1].mxu0 }
 0x102   :  { %v137_v17 = vadd.f32 %v1076_v13, %v136_v16 }
 0x103   :  { %146 = vst [vmem:[#allocation2 + $0x8] sm:$0xff] %v142_v15 }
 0x104   :  { %145 = vst [vmem:[#allocation2] sm:$0xff] %v137_v17  ;;  %v222_v18 = vpop.f32.mrb[0].mxu1 }
 0x105   :  { %v1163_v19 = vpop.f32.mrb[1].mxu1 }
 0x10b   :  { %v151_v20 = vld [vmem:[#allocation2] sm:$0x3]  ;;  %v257_v36 = vld [vmem:[#allocation2 + $0x2] sm:$0x3]  ;;  %v360_v54 = vld [vmem:[#allocation2 + $0x4] sm:$0x3] }
 0x10c   :  { %v226_v21 = vadd.f32 %v222_v18, %v151_v20  ;;  %v463_v11 = vld [vmem:[#allocation2 + $0x6] sm:$0x3] }
 0x10e   :  { %1321 = vtanh.f32 %v226_v21  ;;  %v1079_v23 = vmul.f32 -1.442695, %v226_v21 }
 0x110   :  { %1323 = vpow2.f32 %v1079_v23 }
 0x118   :  { %v1322_v22 = vpop.eup %1321 }
 0x119   :  { %236 = vrot.lane.b32.xlu0 %v1322_v22, %s1440_s30 }
 0x11a   :  { %v1324_v24 = vpop.eup %1323 }
 0x11b   :  { %v230_v25 = vadd.f32 1.0, %v1324_v24 }
 0x11d   :  { %1325 = vrcp.f32 %v230_v25 }
 0x127   :  { %v1326_v26 = vpop.eup %1325 }
 0x128   :  { %v234_v29 = vmul.f32 0.0, %v1326_v26 }
 0x18b   :  { %v237_v27 = vpop.permute.xlu0 %236 }
 0x18c   :  { %v239_v28 = vmul.f32 %v1326_v26, %v237_v27 }
 0x18e   :  { %241 = vrot.lane.b32.xlu0 %v239_v28, %s1441_s3 }
 0x200   :  { %v242_v30 = vpop.permute.xlu0 %241 }
 0x201   :  { %v244_v31 = vadd.f32 %v242_v30, %v234_v29  ;;  %v566_v30 = vld [vmem:[#allocation2 + $0x8] sm:$0x3] }
 0x203   :  { %1327 = vtanh.f32 %v244_v31 }
 0x20d   :  { %v1328_v32 = vpop.eup %1327 }
 0x20e   :  { %247 = vrot.lane.b32.xlu1 %v1328_v32, %s1440_s30 }
 0x280   :  { %v248_v33 = vpop.permute.xlu1 %247 }
 0x281   :  { %v250_v34 = vmul.f32 %v1326_v26, %v248_v33 }
 0x283   :  { %252 = vrot.lane.b32.xlu1 %v250_v34, %s1441_s3 }
 0x2f5   :  { %v253_v35 = vpop.permute.xlu1 %252 }
 0x2f6   :  { %256 = vst.msk [vmem:[#allocation3] sm:$0x3] %vm255_vm2, %v253_v35  ;;  %1173 = vmatmul.mubr.msk.f32.vlgmr.msra.gmra.mrb[2].mxu0 %vm152_vm3, %v253_v35 }
 0x2f7   :  { %1276 = vmatpush3.bf16.msra.mxu0 %v1511_v8  ;;  %1194 = vmatprep.mubr.msk.f32.mxu0 %vm1438_vm0, %v1439_v1 }
 0x2f8   :  { %1277 = vmatprep.subr.bf16.mxu0 %v1437_v0 }
 0x2fb   :  { %1279 = vmatpush3.bf16.msra.mxu0 %v1520_v12 }
 0x2fc   :  { %1286 = vmatprep.subr.bf16.mxu0 %v1437_v0 }
 0x3c9   :  { %v326_v37 = vpop.f32.mrb[2].mxu0 }
 0x3ca   :  { %v330_v38 = vadd.f32 %v326_v37, %v257_v36  ;;  %v1174_v39 = vpop.f32.mrb[3].mxu0 }
 0x3cc   :  { %1329 = vtanh.f32 %v330_v38  ;;  %v1081_v41 = vmul.f32 -1.442695, %v330_v38 }
 0x3ce   :  { %1331 = vpow2.f32 %v1081_v41 }
 0x3d6   :  { %v1330_v40 = vpop.eup %1329 }
 0x3d7   :  { %340 = vrot.lane.b32.xlu0 %v1330_v40, %s1440_s30 }
 0x3d8   :  { %v1332_v42 = vpop.eup %1331 }
 0x3d9   :  { %v334_v43 = vadd.f32 1.0, %v1332_v42 }
 0x3db   :  { %1333 = vrcp.f32 %v334_v43 }
 0x3e5   :  { %v1334_v44 = vpop.eup %1333 }
 0x3e6   :  { %v338_v47 = vmul.f32 %v1334_v44, %v244_v31 }
 0x449   :  { %v341_v45 = vpop.permute.xlu0 %340 }
 0x44a   :  { %v343_v46 = vmul.f32 %v1334_v44, %v341_v45 }
 0x44c   :  { %345 = vrot.lane.b32.xlu1 %v343_v46, %s1441_s3 }
 0x4be   :  { %v346_v48 = vpop.permute.xlu1 %345 }
 0x4bf   :  { %v348_v49 = vadd.f32 %v346_v48, %v338_v47  ;;  %v669_v48 = vld [vmem:[#allocation2 + $0xa] sm:$0x3] }
 0x4c1   :  { %1335 = vtanh.f32 %v348_v49 }
 0x4cb   :  { %v1336_v50 = vpop.eup %1335 }
 0x4cc   :  { %351 = vrot.lane.b32.xlu0 %v1336_v50, %s1440_s30 }
 0x53e   :  { %v352_v51 = vpop.permute.xlu0 %351 }
 0x53f   :  { %v354_v52 = vmul.f32 %v1334_v44, %v352_v51 }
 0x541   :  { %356 = vrot.lane.b32.xlu1 %v354_v52, %s1441_s3 }
 0x5b3   :  { %v357_v53 = vpop.permute.xlu1 %356 }
 0x5b4   :  { %359 = vst.msk [vmem:[#allocation3 + $0x2] sm:$0x3] %vm255_vm2, %v357_v53  ;;  %1184 = vmatmul.mubr.msk.f32.vlgmr.msra.gmra.mrb[2].mxu1 %vm152_vm3, %v357_v53 }
 0x5b5   :  { %1282 = vmatpush3.bf16.msra.mxu1 %v1511_v8  ;;  %1205 = vmatprep.mubr.msk.f32.mxu1 %vm1438_vm0, %v1439_v1 }
 0x5b6   :  { %1283 = vmatprep.subr.bf16.mxu1 %v1437_v0 }
 0x5b9   :  { %1285 = vmatpush3.bf16.msra.mxu1 %v1520_v12 }
 0x5ba   :  { %1292 = vmatprep.subr.bf16.mxu1 %v1437_v0 }
 0x687   :  { %v429_v55 = vpop.f32.mrb[2].mxu1 }
 0x688   :  { %v433_v56 = vadd.f32 %v429_v55, %v360_v54  ;;  %v1185_v57 = vpop.f32.mrb[3].mxu1 }
 0x68a   :  { %1337 = vtanh.f32 %v433_v56  ;;  %v1083_v59 = vmul.f32 -1.442695, %v433_v56 }
 0x68c   :  { %1339 = vpow2.f32 %v1083_v59 }
 0x694   :  { %v1338_v58 = vpop.eup %1337 }
 0x695   :  { %443 = vrot.lane.b32.xlu0 %v1338_v58, %s1440_s30 }
 0x696   :  { %v1340_v60 = vpop.eup %1339 }
 0x697   :  { %v437_v61 = vadd.f32 1.0, %v1340_v60 }
 0x699   :  { %1341 = vrcp.f32 %v437_v61 }
 0x6a3   :  { %v1342_v62 = vpop.eup %1341 }
 0x6a4   :  { %v441_v3 = vmul.f32 %v1342_v62, %v348_v49 }
 0x707   :  { %v444_v63 = vpop.permute.xlu0 %443 }
 0x708   :  { %v446_v2 = vmul.f32 %v1342_v62, %v444_v63  ;;  %v772_v63 = vld [vmem:[#allocation2 + $0xc] sm:$0x3] }
 0x70a   :  { %448 = vrot.lane.b32.xlu1 %v446_v2, %s1441_s3 }
 0x77c   :  { %v449_v4 = vpop.permute.xlu1 %448 }
 0x77d   :  { %v451_v5 = vadd.f32 %v449_v4, %v441_v3 }
 0x77f   :  { %1343 = vtanh.f32 %v451_v5 }
 0x789   :  { %v1344_v6 = vpop.eup %1343 }
 0x78a   :  { %454 = vrot.lane.b32.xlu0 %v1344_v6, %s1440_s30 }
 0x7fc   :  { %v455_v7 = vpop.permute.xlu0 %454 }
 0x7fd   :  { %v457_v9 = vmul.f32 %v1342_v62, %v455_v7 }
 0x7ff   :  { %459 = vrot.lane.b32.xlu1 %v457_v9, %s1441_s3 }
 0x871   :  { %v460_v10 = vpop.permute.xlu1 %459 }
 0x872   :  { %462 = vst.msk [vmem:[#allocation3 + $0x4] sm:$0x3] %vm255_vm2, %v460_v10  ;;  %1195 = vmatmul.mubr.msk.f32.vlgmr.msra.gmra.mrb[4].mxu0 %vm152_vm3, %v460_v10 }
 0x873   :  { %1288 = vmatpush3.bf16.msra.mxu0 %v1511_v8  ;;  %1216 = vmatprep.mubr.msk.f32.mxu0 %vm1438_vm0, %v1439_v1 }
 0x874   :  { %1289 = vmatprep.subr.bf16.mxu0 %v1437_v0 }
 0x877   :  { %1291 = vmatpush3.bf16.msra.mxu0 %v1520_v12 }
 0x878   :  { %1298 = vmatprep.subr.bf16.mxu0 %v1437_v0 }
 0x945   :  { %v532_v13 = vpop.f32.mrb[4].mxu0 }
 0x946   :  { %v536_v14 = vadd.f32 %v532_v13, %v463_v11  ;;  %v1196_v15 = vpop.f32.mrb[5].mxu0 }
 0x948   :  { %1345 = vtanh.f32 %v536_v14  ;;  %v1085_v17 = vmul.f32 -1.442695, %v536_v14 }
 0x94a   :  { %1347 = vpow2.f32 %v1085_v17 }
 0x952   :  { %v1346_v16 = vpop.eup %1345 }
 0x953   :  { %546 = vrot.lane.b32.xlu0 %v1346_v16, %s1440_s30 }
 0x954   :  { %v1348_v18 = vpop.eup %1347 }
 0x955   :  { %v540_v19 = vadd.f32 1.0, %v1348_v18 }
 0x957   :  { %1349 = vrcp.f32 %v540_v19 }
 0x961   :  { %v1350_v20 = vpop.eup %1349 }
 0x962   :  { %v544_v23 = vmul.f32 %v1350_v20, %v451_v5 }
 0x9c5   :  { %v547_v21 = vpop.permute.xlu0 %546 }
 0x9c6   :  { %v549_v22 = vmul.f32 %v1350_v20, %v547_v21  ;;  %v875_v21 = vld [vmem:[#allocation2 + $0xe] sm:$0x3] }
 0x9c8   :  { %551 = vrot.lane.b32.xlu1 %v549_v22, %s1441_s3 }
 0xa3a   :  { %v552_v24 = vpop.permute.xlu1 %551 }
 0xa3b   :  { %v554_v25 = vadd.f32 %v552_v24, %v544_v23 }
 0xa3d   :  { %1351 = vtanh.f32 %v554_v25 }
 0xa47   :  { %v1352_v26 = vpop.eup %1351 }
 0xa48   :  { %557 = vrot.lane.b32.xlu0 %v1352_v26, %s1440_s30 }
 0xaba   :  { %v558_v27 = vpop.permute.xlu0 %557 }
 0xabb   :  { %v560_v28 = vmul.f32 %v1350_v20, %v558_v27 }
 0xabd   :  { %562 = vrot.lane.b32.xlu1 %v560_v28, %s1441_s3 }
 0xb2f   :  { %v563_v29 = vpop.permute.xlu1 %562 }
 0xb30   :  { %565 = vst.msk [vmem:[#allocation3 + $0x6] sm:$0x3] %vm255_vm2, %v563_v29  ;;  %1206 = vmatmul.mubr.msk.f32.vlgmr.msra.gmra.mrb[4].mxu1 %vm152_vm3, %v563_v29 }
 0xb31   :  { %1294 = vmatpush3.bf16.msra.mxu1 %v1511_v8  ;;  %1227 = vmatprep.mubr.msk.f32.mxu1 %vm1438_vm0, %v1439_v1 }
 0xb32   :  { %1295 = vmatprep.subr.bf16.mxu1 %v1437_v0 }
 0xb35   :  { %1297 = vmatpush3.bf16.msra.mxu1 %v1520_v12 }
 0xb37   :  { %v978_v62 = vld [vmem:[#allocation3] sm:$0xff] }
 0xc03   :  { %v635_v31 = vpop.f32.mrb[4].mxu1 }
 0xc04   :  { %v639_v32 = vadd.f32 %v635_v31, %v566_v30  ;;  %v1207_v33 = vpop.f32.mrb[5].mxu1 }
 0xc06   :  { %1353 = vtanh.f32 %v639_v32  ;;  %v1087_v35 = vmul.f32 -1.442695, %v639_v32 }
 0xc08   :  { %1355 = vpow2.f32 %v1087_v35 }
 0xc10   :  { %v1354_v34 = vpop.eup %1353 }
 0xc11   :  { %649 = vrot.lane.b32.xlu0 %v1354_v34, %s1440_s30 }
 0xc12   :  { %v1356_v36 = vpop.eup %1355 }
 0xc13   :  { %v643_v37 = vadd.f32 1.0, %v1356_v36  ;;  %v980_v36 = vld [vmem:[%s1645_s4] sm:$0xff] }
 0xc15   :  { %1357 = vrcp.f32 %v643_v37  ;;  %v981_v37 = vld [vmem:[%s1645_s4 + $0x8] sm:$0xff] }
 0xc1f   :  { %v1358_v38 = vpop.eup %1357 }
 0xc20   :  { %v647_v41 = vmul.f32 %v1358_v38, %v554_v25 }
 0xc83   :  { %v650_v39 = vpop.permute.xlu0 %649 }
 0xc84   :  { %v652_v40 = vmul.f32 %v1358_v38, %v650_v39  ;;  %v982_v39 = vld [vmem:[%s1645_s4 + $0x10] sm:$0xff] }
 0xc86   :  { %654 = vrot.lane.b32.xlu1 %v652_v40, %s1441_s3  ;;  %v983_v40 = vld [vmem:[%s1645_s4 + $0x18] sm:$0xff] }
 0xcf8   :  { %v655_v42 = vpop.permute.xlu1 %654 }
 0xcf9   :  { %v657_v43 = vadd.f32 %v655_v42, %v647_v41  ;;  %v1308_v41 = vpack.c.bf16 %v983_v40, %v982_v39 }
 0xcfb   :  { %1359 = vtanh.f32 %v657_v43 }
 0xd05   :  { %v1360_v44 = vpop.eup %1359 }
 0xd06   :  { %660 = vrot.lane.b32.xlu0 %v1360_v44, %s1440_s30 }
 0xd78   :  { %v661_v45 = vpop.permute.xlu0 %660 }
 0xd79   :  { %v663_v46 = vmul.f32 %v1358_v38, %v661_v45  ;;  %v1304_v38 = vpack.c.bf16 %v981_v37, %v980_v36 }
 0xd7b   :  { %665 = vrot.lane.b32.xlu1 %v663_v46, %s1441_s3  ;;  %1305 = vmatprep.subr.bf16.mxu1 %v1304_v38  ;;  %v985_v46 = vstv %s1646_s5 }
 0xded   :  { %v666_v47 = vpop.permute.xlu1 %665 }
 0xdee   :  { %668 = vst.msk [vmem:[#allocation3 + $0x8] sm:$0x3] %vm255_vm2, %v666_v47  ;;  %1217 = vmatmul.mubr.msk.f32.vlgmr.msra.gmra.mrb[6].mxu0 %vm152_vm3, %v666_v47 }
 0xdef   :  { %1300 = vmatpush3.bf16.msra.mxu0 %v1511_v8  ;;  %1238 = vmatprep.mubr.msk.f32.mxu0 %vm1438_vm0, %v1439_v1 }
 0xdf0   :  { %1301 = vmatprep.subr.bf16.mxu0 %v1437_v0 }
 0xdf3   :  { %1303 = vmatpush3.bf16.msra.mxu0 %v1520_v12 }
 0xec1   :  { %v738_v49 = vpop.f32.mrb[6].mxu0 }
 0xec2   :  { %v742_v50 = vadd.f32 %v738_v49, %v669_v48  ;;  %v1218_v51 = vpop.f32.mrb[7].mxu0 }
 0xec4   :  { %1361 = vtanh.f32 %v742_v50  ;;  %v1089_v53 = vmul.f32 -1.442695, %v742_v50 }
 0xec6   :  { %1363 = vpow2.f32 %v1089_v53 }
 0xece   :  { %v1362_v52 = vpop.eup %1361 }
 0xecf   :  { %752 = vrot.lane.b32.xlu0 %v1362_v52, %s1440_s30 }
 0xed0   :  { %v1364_v54 = vpop.eup %1363 }
 0xed1   :  { %v746_v55 = vadd.f32 1.0, %v1364_v54 }
 0xed3   :  { %1365 = vrcp.f32 %v746_v55 }
 0xedd   :  { %v1366_v8 = vpop.eup %1365 }
 0xede   :  { %v750_v0 = vmul.f32 %v1366_v8, %v657_v43 }
 0xf41   :  { %v753_v56 = vpop.permute.xlu0 %752 }
 0xf42   :  { %v755_v1 = vmul.f32 %v1366_v8, %v753_v56 }
 0xf44   :  { %757 = vrot.lane.b32.xlu1 %v755_v1, %s1441_s3 }
 0xfb6   :  { %v758_v12 = vpop.permute.xlu1 %757 }
 0xfb7   :  { %v760_v57 = vadd.f32 %v758_v12, %v750_v0 }
 0xfb9   :  { %1367 = vtanh.f32 %v760_v57 }
 0xfc3   :  { %v1368_v58 = vpop.eup %1367 }
 0xfc4   :  { %763 = vrot.lane.b32.xlu0 %v1368_v58, %s1440_s30 }
0x1036   :  { %v764_v59 = vpop.permute.xlu0 %763 }
0x1037   :  { %v766_v60 = vmul.f32 %v1366_v8, %v764_v59 }
0x1039   :  { %768 = vrot.lane.b32.xlu1 %v766_v60, %s1441_s3 }
0x10ab   :  { %v769_v61 = vpop.permute.xlu1 %768 }
0x10ac   :  { %771 = vst.msk [vmem:[#allocation3 + $0xa] sm:$0x3] %vm255_vm2, %v769_v61  ;;  %1228 = vmatmul.mubr.msk.f32.vlgmr.msra.gmra.mrb[6].mxu1 %vm152_vm3, %v769_v61 }
0x10ad   :  { %1249 = vmatprep.mubr.msk.f32.mxu1 %vm152_vm3, %v978_v62  ;;  %1307 = vmatpush3.bf16.msra.mxu1 %v1304_v38 }
0x10ae   :  { %1309 = vmatprep.subr.bf16.mxu1 %v1308_v41 }
0x10b1   :  { %1311 = vmatpush3.bf16.msra.mxu1 %v1308_v41 }
0x117f   :  { %v841_v2 = vpop.f32.mrb[6].mxu1 }
0x1180   :  { %v845_v3 = vadd.f32 %v841_v2, %v772_v63  ;;  %v1229_v4 = vpop.f32.mrb[7].mxu1 }
0x1182   :  { %1369 = vtanh.f32 %v845_v3  ;;  %v1091_v6 = vmul.f32 -1.442695, %v845_v3 }
0x1184   :  { %1371 = vpow2.f32 %v1091_v6 }
0x118c   :  { %v1370_v5 = vpop.eup %1369 }
0x118d   :  { %855 = vrot.lane.b32.xlu0 %v1370_v5, %s1440_s30 }
0x118e   :  { %v1372_v7 = vpop.eup %1371 }
0x118f   :  { %v849_v9 = vadd.f32 1.0, %v1372_v7 }
0x1191   :  { %1373 = vrcp.f32 %v849_v9 }
0x119b   :  { %v1374_v10 = vpop.eup %1373 }
0x119c   :  { %v853_v14 = vmul.f32 %v1374_v10, %v760_v57 }
0x11ff   :  { %v856_v11 = vpop.permute.xlu0 %855 }
0x1200   :  { %v858_v13 = vmul.f32 %v1374_v10, %v856_v11 }
0x1202   :  { %860 = vrot.lane.b32.xlu1 %v858_v13, %s1441_s3 }
0x1274   :  { %v861_v15 = vpop.permute.xlu1 %860 }
0x1275   :  { %v863_v16 = vadd.f32 %v861_v15, %v853_v14 }
0x1277   :  { %1375 = vtanh.f32 %v863_v16 }
0x1281   :  { %v1376_v17 = vpop.eup %1375 }
0x1282   :  { %866 = vrot.lane.b32.xlu0 %v1376_v17, %s1440_s30 }
0x12f4   :  { %v867_v18 = vpop.permute.xlu0 %866 }
0x12f5   :  { %v869_v19 = vmul.f32 %v1374_v10, %v867_v18 }
0x12f7   :  { %871 = vrot.lane.b32.xlu1 %v869_v19, %s1441_s3 }
0x1369   :  { %v872_v20 = vpop.permute.xlu1 %871 }
0x136a   :  { %874 = vst.msk [vmem:[#allocation3 + $0xc] sm:$0x3] %vm255_vm2, %v872_v20  ;;  %1239 = vmatmul.mubr.msk.f32.vlgmr.msra.gmra.mrb[8].mxu0 %vm152_vm3, %v872_v20 }
0x143d   :  { %v944_v22 = vpop.f32.mrb[8].mxu0 }
0x143e   :  { %v948_v23 = vadd.f32 %v944_v22, %v875_v21  ;;  %v1240_v24 = vpop.f32.mrb[9].mxu0 }
0x1440   :  { %1377 = vtanh.f32 %v948_v23  ;;  %v1093_v26 = vmul.f32 -1.442695, %v948_v23 }
0x1442   :  { %1379 = vpow2.f32 %v1093_v26 }
0x144a   :  { %v1378_v25 = vpop.eup %1377 }
0x144b   :  { %958 = vrot.lane.b32.xlu0 %v1378_v25, %s1440_s30 }
0x144c   :  { %v1380_v27 = vpop.eup %1379 }
0x144d   :  { %v952_v28 = vadd.f32 1.0, %v1380_v27 }
0x144f   :  { %1381 = vrcp.f32 %v952_v28 }
0x1459   :  { %v1382_v29 = vpop.eup %1381 }
0x145a   :  { %v956_v32 = vmul.f32 %v1382_v29, %v863_v16 }
0x14bd   :  { %v959_v30 = vpop.permute.xlu0 %958 }
0x14be   :  { %v961_v31 = vmul.f32 %v1382_v29, %v959_v30 }
0x14c0   :  { %963 = vrot.lane.b32.xlu1 %v961_v31, %s1441_s3 }
0x1532   :  { %v964_v33 = vpop.permute.xlu1 %963 }
0x1533   :  { %v966_v34 = vadd.f32 %v964_v33, %v956_v32 }
0x1535   :  { %1383 = vtanh.f32 %v966_v34 }
0x153f   :  { %v1384_v35 = vpop.eup %1383 }
0x1540   :  { %969 = vrot.lane.b32.xlu0 %v1384_v35, %s1440_s30 }
0x15b2   :  { %v970_v42 = vpop.permute.xlu0 %969 }
0x15b3   :  { %v972_v43 = vmul.f32 %v1382_v29, %v970_v42 }
0x15b5   :  { %974 = vrot.lane.b32.xlu1 %v972_v43, %s1441_s3 }
0x1627   :  { %v975_v44 = vpop.permute.xlu1 %974 }
0x1628   :  { %977 = vst.msk [vmem:[#allocation3 + $0xe] sm:$0x3] %vm255_vm2, %v975_v44 }
0x162f   :  { %v979_v45 = vld [vmem:[#allocation3 + $0x8] sm:$0xff] }
0x1630   :  { %1250 = vmatmul.mubr.msk.f32.vlgmr.msra.gmra.mrb[8].mxu1 %vm152_vm3, %v979_v45 }
0x1703   :  { %v1251_v47 = vpop.f32.mrb[8].mxu1 }
0x1704   :  { %v1064_v48 = vadd.f32 %v1251_v47, %v985_v46  ;;  %v1058_v49 = vpop.f32.mrb[9].mxu1 }
0x1705   :  { %v1059_v50 = vadd.f32 %v1058_v49, %v985_v46 }
0x1706   :  { %1069 = vst.msk [vmem:[%s1647_s6 + $0x8] sm:$0xff] %vm1067_vm4, %v1064_v48 }
0x1707   :  { %1068 = vst.msk [vmem:[%s1647_s6] sm:$0xff] %vm1067_vm4, %v1059_v50 }
0x1708   :  { %1074 = vsyncpa [#allocation6], 1 }
0x1709   :  { %1075 = vsyncpa [#allocation8], 1 }

</bundles_post_ra>
